<compile_context>
chip_gen: v6e
topology: v6e:2x2x1
jax: 0.10.0
libtpu: 0.0.40
codegen_flags: <defaults>
</compile_context>

<pallas_src>
import functools

import jax
import jax.numpy as jnp
from jax.experimental import pallas as pl
from jax.experimental.pallas import tpu as pltpu

_SUBLANE = 8


def _round_up(x: int, m: int) -> int:
    return (x + m - 1) // m * m


def _pick_tile_b(batch: int, num_features: int, requested, x_dtype_bytes: int,
                 x_pair_budget_bytes: int = 4 * 1024 * 1024) -> int:
    """Batch-tile rows such that the DOUBLE-BUFFERED x tile fits the budget."""
    if requested is not None:
        tile = int(requested)
    else:
        tile = x_pair_budget_bytes // (2 * num_features * x_dtype_bytes)
    tile = min(tile, _round_up(batch, _SUBLANE))
    return max(_SUBLANE, (tile // _SUBLANE) * _SUBLANE)


def _batch_dim_semantics(num_tiles: int):
    """CORE_PARALLEL on multi-TensorCore chips (v7x), 'parallel' elsewhere."""
    if num_tiles > 1:
        try:
            kind = jax.devices()[0].device_kind.lower()
            if "v7" in kind or "7x" in kind:
                return (pltpu.CORE_PARALLEL,)
        except Exception:
            pass
    return ("parallel",)


def mlp_kernel(x_ref, w1_ref, b1_ref, w2_ref, b2_ref, o_ref, *, precision=None):
    """One batch tile of: sigmoid(relu(x @ W1 + b1) @ W2^T + b2).

    x_ref : (TILE_B, F)    VMEM, streamed per grid step (f32 or bf16)
    w1_ref: (F, H)         VMEM, resident (same dtype as x)
    b1_ref: (1, H)         VMEM, resident, f32
    w2_ref: (8, H)         VMEM, resident, f32 (row 0 = real W2, rows 1..7 pad)
    b2_ref: (1, 1)         SMEM scalar, f32
    o_ref : (1, 1, TILE_B) VMEM, lane-dense (batch on lanes), f32
    """
    # Layer 1 on the MXU, f32 accumulation; VPU math stays f32.
    h = jnp.dot(x_ref[...], w1_ref[...],
                preferred_element_type=jnp.float32, precision=precision)
    h = jnp.maximum(h + b1_ref[...], 0.0)                        # (TILE_B, H)

    # Layer 2 as a transposed product: (8, H) x (TILE_B, H)^T -> (8, TILE_B),
    # putting the batch dimension on the lane axis so the output store is
    # lane-dense instead of a masked single-lane store per row.
    # TODO(synk): bundle-dump check that Mosaic does not emit an explicit XLU
    # transpose of h; at the ~2 MiB tiles chosen here any transpose is hidden
    # under the x DMA.
    z = jnp.einsum("oh,bh->ob", w2_ref[...], h,
                   preferred_element_type=jnp.float32,
                   precision=precision)                          # (8, TILE_B)
    z0 = z[0:1, :] + b2_ref[0, 0]                                # (1, TILE_B)
    o_ref[0] = jax.nn.sigmoid(z0)


@functools.partial(
    jax.jit, static_argnames=("tile_b", "use_bf16", "matmul_precision"))
def simple_nn_forward(x, w1_t, b1, w2, b2, *, tile_b=None, use_bf16=False,
                      matmul_precision=None):
    """x: [B, F]; w1_t: [F, H] (= PyTorch layer1.weight.T); b1: [H] or [1, H];
    w2: [1, H] (= PyTorch layer2.weight); b2: [1] or [1, 1].  Returns [B, 1] f32.

    use_bf16=True streams x/W1 as bf16 (f32 MXU accumulation) for ~2x on this
    HBM-bound kernel; matmul_precision=jax.lax.Precision.HIGHEST gives strict
    f32 parity with the PyTorch module at large feature counts."""
    B, F = x.shape
    H = w1_t.shape[1]

    stream_dtype = jnp.bfloat16 if use_bf16 else jnp.float32
    stream_bytes = 2 if use_bf16 else 4
    x = x.astype(stream_dtype)
    w1 = w1_t.astype(stream_dtype)

    tb = _pick_tile_b(B, F, tile_b, stream_bytes)
    num_tiles = pl.cdiv(B, tb)          # no jnp.pad: partial last block is fine
                                        # (rows are independent; tail sliced off)

    b1_2d = b1.reshape(1, H).astype(jnp.float32)
    b2_2d = b2.reshape(1, 1).astype(jnp.float32)
    # Pad W2 [1, H] -> [8, H] so the MXU operand is sublane-aligned; padded
    # rows produce garbage that is discarded inside the kernel.
    w2_pad = jnp.zeros((8, H), jnp.float32).at[0:1, :].set(
        w2.reshape(1, H).astype(jnp.float32))

    kernel = functools.partial(mlp_kernel, precision=matmul_precision)

    out = pl.pallas_call(
        kernel,
        grid=(num_tiles,),
        in_specs=[
            pl.BlockSpec((tb, F), lambda i: (i, 0)),      # x: streamed tiles
            pl.BlockSpec((F, H), lambda i: (0, 0)),       # W1: resident
            pl.BlockSpec((1, H), lambda i: (0, 0)),       # b1: resident
            pl.BlockSpec((8, H), lambda i: (0, 0)),       # W2 (padded): resident
            pl.BlockSpec(memory_space=pltpu.SMEM),        # b2: scalar in SMEM
        ],
        out_specs=pl.BlockSpec((1, 1, tb), lambda i: (i, 0, 0)),
        out_shape=jax.ShapeDtypeStruct((num_tiles, 1, tb), jnp.float32),
        compiler_params=pltpu.CompilerParams(
            dimension_semantics=_batch_dim_semantics(num_tiles),
            vmem_limit_bytes=32 * 1024 * 1024,   # fits v5e/v6e and v7x (64 MiB)
        ),
        cost_estimate=pl.CostEstimate(
            flops=2 * B * F * H + 2 * B * H * 8,
            transcendentals=B,                   # one sigmoid exp per row
            bytes_accessed=(B * F * stream_bytes + F * H * stream_bytes
                            + (8 * H + H + 1) * 4 + num_tiles * tb * 4),
        ),
    )(x, w1, b1_2d, w2_pad, b2_2d)

    # Lane-dense (num_tiles, 1, tb) -> (B, 1); pure layout plumbing.
    return out.reshape(num_tiles * tb, 1)[:B]


def init_params(num_features, hidden=64, key=jax.random.PRNGKey(0)):
    """Deterministic init mimicking PyTorch Linear default (uniform +-1/sqrt(fan_in))."""
    k1, k2, k3, k4 = jax.random.split(key, 4)
    bound1 = 1.0 / jnp.sqrt(num_features)
    bound2 = 1.0 / jnp.sqrt(hidden)
    # layer1 weight stored transposed ([in, out]) for the kernel; layer2 weight
    # kept in PyTorch [out, in] = [1, hidden] layout.
    w1_t = jax.random.uniform(k1, (num_features, hidden), jnp.float32, -bound1, bound1)
    b1 = jax.random.uniform(k2, (1, hidden), jnp.float32, -bound1, bound1)
    w2 = jax.random.uniform(k3, (1, hidden), jnp.float32, -bound2, bound2)
    b2 = jax.random.uniform(k4, (1, 1), jnp.float32, -bound2, bound2)
    return w1_t, b1, w2, b2


if __name__ == "__main__":
    # Small deterministic demo consistent with the module: batch=8, features=32.
    batch, num_features = 8, 32

    key = jax.random.PRNGKey(0)
    x_key, p_key = jax.random.split(key)
    x = jax.random.normal(x_key, (batch, num_features), jnp.float32)
    w1_t, b1, w2, b2 = init_params(num_features, key=p_key)

    def ref_fn(xx):   # Pure-JAX reference (PyTorch forward semantics).
        return jax.nn.sigmoid(jnp.maximum(xx @ w1_t + b1, 0.0) @ w2.T + b2)

    out = simple_nn_forward(x, w1_t, b1, w2, b2)
    jax.block_until_ready(out)
    assert out.shape == (batch, 1)
    assert jnp.allclose(out, ref_fn(x), atol=1e-5), "mismatch vs reference (small batch)"

    # Larger batch, not a multiple of the tile: exercises the pad-free partial
    # last block (auto tile) and the multi-tile pipelined grid (tile_b=1024).
    big_b = 2500
    xb = jax.random.normal(jax.random.PRNGKey(1), (big_b, num_features), jnp.float32)
    ref_b = ref_fn(xb)

    out_b = simple_nn_forward(xb, w1_t, b1, w2, b2)          # auto tile, 1 tile
    jax.block_until_ready(out_b)
    assert out_b.shape == (big_b, 1)
    assert jnp.allclose(out_b, ref_b, atol=1e-5), "mismatch vs reference (auto tile)"

    out_t = simple_nn_forward(xb, w1_t, b1, w2, b2, tile_b=1024)  # 3 tiles, ragged tail
    jax.block_until_ready(out_t)
    assert jnp.allclose(out_t, ref_b, atol=1e-5), "mismatch vs reference (multi-tile)"

    # Optional bf16 streaming path (~2x HBM traffic reduction), looser tolerance.
    out_h = simple_nn_forward(xb, w1_t, b1, w2, b2, use_bf16=True)
    jax.block_until_ready(out_h)
    assert jnp.allclose(out_h, ref_b, atol=2e-2), "mismatch vs reference (bf16)"

    print("KERNEL_OK")
</pallas_src>

<mosaic_0001>
module attributes {stable_mosaic.version = 11 : i64} {
  func.func @mlp_kernel(%arg0: i32, %arg1: memref<8x32xf32, #tpu.memory_space<vmem>>, %arg2: memref<32x64xf32, #tpu.memory_space<vmem>>, %arg3: memref<1x64xf32, #tpu.memory_space<vmem>>, %arg4: memref<8x64xf32, #tpu.memory_space<vmem>>, %arg5: memref<1x1xf32, #tpu.memory_space<smem>>, %arg6: memref<1x1x8xf32, #tpu.memory_space<vmem>>) attributes {dimension_semantics = [#tpu.dimension_semantics<parallel>], iteration_bounds = array<i64: 1>, scalar_prefetch = 0 : i64, scratch_operands = 0 : i64, tpu.core_type = #tpu.core_type<tc>, window_params = [{transform_indices = @transform_0, window_bounds = array<i64: 8, 32>}, {pipeline_mode = #tpu.pipeline_mode<synchronous>, transform_indices = @transform_1, window_bounds = array<i64: 32, 64>}, {pipeline_mode = #tpu.pipeline_mode<synchronous>, transform_indices = @transform_2, window_bounds = array<i64: 1, 64>}, {pipeline_mode = #tpu.pipeline_mode<synchronous>, transform_indices = @transform_3, window_bounds = array<i64: 8, 64>}, {transform_indices = @transform_4, window_bounds = array<i64: 1, 1>}, {transform_indices = @transform_5, window_bounds = array<i64: 1, 1, 8>}]} {
    %c0 = arith.constant 0 : index
    %c0_0 = arith.constant 0 : index
    %0 = vector.load %arg1[%c0, %c0_0] : memref<8x32xf32, #tpu.memory_space<vmem>>, vector<8x32xf32>
    %c0_1 = arith.constant 0 : index
    %c0_2 = arith.constant 0 : index
    %1 = vector.load %arg2[%c0_1, %c0_2] : memref<32x64xf32, #tpu.memory_space<vmem>>, vector<32x64xf32>
    %cst = arith.constant dense<0.000000e+00> : vector<8x64xf32>
    %2 = tpu.matmul %0, %1, %cst {dimension_numbers = #tpu.dot_dimension_numbers<[1], [0], [0], [1], [0, 0, 1, 1], [], []>} : vector<8x32xf32>, vector<32x64xf32>, vector<8x64xf32> -> vector<8x64xf32>
    %c0_3 = arith.constant 0 : index
    %c0_4 = arith.constant 0 : index
    %3 = vector.load %arg3[%c0_3, %c0_4] : memref<1x64xf32, #tpu.memory_space<vmem>>, vector<1x64xf32>
    %4 = vector.broadcast %3 : vector<1x64xf32> to vector<8x64xf32>
    %5 = arith.addf %2, %4 : vector<8x64xf32>
    %cst_5 = arith.constant 0.000000e+00 : f32
    %6 = vector.broadcast %cst_5 : f32 to vector<8x64xf32>
    %7 = arith.maximumf %5, %6 : vector<8x64xf32>
    %c0_6 = arith.constant 0 : index
    %c0_7 = arith.constant 0 : index
    %8 = vector.load %arg4[%c0_6, %c0_7] : memref<8x64xf32, #tpu.memory_space<vmem>>, vector<8x64xf32>
    "tpu.trace_start"() <{level = 10 : i32, message = "oh,bh->ob"}> : () -> ()
    %cst_8 = arith.constant dense<0.000000e+00> : vector<8x8xf32>
    %9 = tpu.matmul %8, %7, %cst_8 {dimension_numbers = #tpu.dot_dimension_numbers<[1], [1], [0], [0], [0, 0, 1, 0], [], []>} : vector<8x64xf32>, vector<8x64xf32>, vector<8x8xf32> -> vector<8x8xf32>
    "tpu.trace_stop"() : () -> ()
    %10 = vector.extract_strided_slice %9 {offsets = [0, 0], sizes = [1, 8], strides = [1, 1]} : vector<8x8xf32> to vector<1x8xf32>
    %c0_9 = arith.constant 0 : index
    %c0_10 = arith.constant 0 : index
    %11 = memref.load %arg5[%c0_9, %c0_10] : memref<1x1xf32, #tpu.memory_space<smem>>
    %12 = vector.broadcast %11 : f32 to vector<1x8xf32>
    %13 = arith.addf %10, %12 : vector<1x8xf32>
    %14 = arith.negf %13 : vector<1x8xf32>
    %15 = math.exp %14 : vector<1x8xf32>
    %cst_11 = arith.constant 1.000000e+00 : f32
    %16 = vector.broadcast %cst_11 : f32 to vector<1x8xf32>
    %17 = arith.addf %16, %15 : vector<1x8xf32>
    %18 = arith.divf %16, %17 : vector<1x8xf32>
    %c0_12 = arith.constant 0 : index
    %c0_13 = arith.constant 0 : index
    %c0_14 = arith.constant 0 : index
    %19 = vector.load %arg6[%c0_12, %c0_13, %c0_14] : memref<1x1x8xf32, #tpu.memory_space<vmem>>, vector<1x1x8xf32>
    %20 = vector.shape_cast %19 : vector<1x1x8xf32> to vector<1x8xf32>
    %21 = vector.shape_cast %18 : vector<1x8xf32> to vector<1x1x8xf32>
    tpu.vector_store %arg6[%c0_12, %c0_13, %c0_14], %21 {strides = array<i32>} : memref<1x1x8xf32, #tpu.memory_space<vmem>>, vector<1x1x8xf32>,
    return
  }
  func.func @transform_0(%arg0: i32) -> (i32, i32) {
    %c0_i32 = arith.constant 0 : i32
    %c0_i32_0 = arith.constant 0 : i32
    return %arg0, %c0_i32 : i32, i32
  }
  func.func @transform_1(%arg0: i32) -> (i32, i32) {
    %c0_i32 = arith.constant 0 : i32
    %c0_i32_0 = arith.constant 0 : i32
    %c0_i32_1 = arith.constant 0 : i32
    return %c0_i32, %c0_i32_0 : i32, i32
  }
  func.func @transform_2(%arg0: i32) -> (i32, i32) {
    %c0_i32 = arith.constant 0 : i32
    %c0_i32_0 = arith.constant 0 : i32
    %c0_i32_1 = arith.constant 0 : i32
    return %c0_i32, %c0_i32_0 : i32, i32
  }
  func.func @transform_3(%arg0: i32) -> (i32, i32) {
    %c0_i32 = arith.constant 0 : i32
    %c0_i32_0 = arith.constant 0 : i32
    %c0_i32_1 = arith.constant 0 : i32
    return %c0_i32, %c0_i32_0 : i32, i32
  }
  func.func @transform_4(%arg0: i32) -> (i32, i32) {
    %c0_i32 = arith.constant 0 : i32
    %c0_i32_0 = arith.constant 0 : i32
    %c0_i32_1 = arith.constant 0 : i32
    return %c0_i32, %c0_i32_0 : i32, i32
  }
  func.func @transform_5(%arg0: i32) -> (i32, i32, i32) {
    %c0_i32 = arith.constant 0 : i32
    %c0_i32_0 = arith.constant 0 : i32
    %c0_i32_1 = arith.constant 0 : i32
    return %arg0, %c0_i32, %c0_i32_0 : i32, i32, i32
  }
}

</mosaic_0001>

<bundles_post_ra>
// kernel: simple_nn_forward.1
= control target key start
LH: loop header
LB: loop body
LE: loop exit
PB: predicated region body
PF: predicated region fallthrough
CT: control target
= control target key end

     0   :  { %11 = vsyncpa [#allocation4], 0  ;;  %s363_s0 = inlined_call_operand.vmem [shape: f32[8,32], index: 0, kind: input, shape index: {}]   ;;  %s364_s1 = inlined_call_operand.hbm [shape: f32[32,64], index: 1, kind: input, shape index: {}]   ;;  %s365_s2 = inlined_call_operand.vmem [shape: f32[1,64], index: 2, kind: input, shape index: {}]   ;;  %s366_s3 = inlined_call_operand.vmem [shape: f32[8,64], index: 3, kind: input, shape index: {}]   ;;  %s367_s4 = inlined_call_operand.<no memory space> [shape: f32[1,1], index: 4, kind: input, shape index: {}]   ;;  %s368_s5 = inlined_call_operand.hbm [shape: f32[1,1,8], index: 5, kind: output, shape index: {}]  }
   0x1   :  { %12 = vsyncpa [#allocation5], 0  ;;  %s309_s18 = smov [#allocation3]  }
   0x2   :  { %s20_s19 = sshll.u32 %s309_s18, 4  ;;  %s21_s19 = int_to_ptr.vmem [resolvable:$true] %s20_s19 }
   0x3   :  { %s273_s20 = scalar_lea.vmem %s21_s19, 512  ;;  %p278_p1 = scmp.lt.s32.totalorder %s21_s19, %s21_s19 }
   0x4   :  { %p274_p0 = scmp.ne.s32.totalorder %s21_s19, %s273_s20  ;;  %p279_p2 = scmp.lt.s32.totalorder %s273_s20, %s273_s20 }
   0x6   :  { %p280_p3 = por %p279_p2, %p278_p1 }
   0x8   :  { %p281_p4 = pnand %p280_p3, %p274_p0 }
   0xa   :  { %284 = shalt.err (!%p281_p4)
}
   0xb   :  { %s310_s21 = smov 128   ;;  %s311_s22 = smov 8  }
   0xc   :  { %26 = dma.hbm_to_vmem [thread:$0]  %s364_s1, 512, %s21_s19, [#allocation4], %s310_s21, %s310_s21, %s311_s22  }
   0xd   :  { %305 = dma.done.wait [#allocation4], 512  }
   0xe   :  { %306 = vsyncadd [#allocation4], 4294966784  ;;  %v312_v0 = vmov 0.0   ;;  %vm313_vm0 = vmmov 0   ;;  %v40_v1 = vld [vmem:[#allocation3 + $0x18] sm:$0xff]  ;;  %v39_v2 = vld [vmem:[#allocation3 + $0x10] sm:$0xff]  ;;  %v202_v12 = vstv %s367_s4 }
   0xf   :  { %239 = vmatprep.subr.mxu0 %v312_v0  ;;  %247 = vmatprep.mubr.msk.f32.mxu0 %vm313_vm0, %v312_v0  ;;  %v38_v3 = vld [vmem:[#allocation3 + $0x8] sm:$0xff]  ;;  %v37_v4 = vld [vmem:[#allocation3] sm:$0xff]  ;;  %vm48_vm1 = vcmask 261120   ;;  %vm124_vm2 = vcmask 523264   ;;  %vm210_vm3 = vcmask 57344  }
  0x10   :  { %250 = vmatprep.subr.mxu1 %v312_v0  ;;  %252 = vmatprep.mubr.msk.f32.mxu1 %vm313_vm0, %v312_v0  ;;  %v36_v5 = vld [vmem:[%s363_s0] sm:$0xff] }
  0x11   :  { %240 = vmatpush3.msra.mxu0 %v40_v1  ;;  %v227_v6 = vld [vmem:[%s365_s2] ss:$0 sm:$0xff]  ;;  %s314_s2 = smov [#allocation6]  }
  0x12   :  { %241 = vmatprep.subr.mxu0 %v312_v0  ;;  %v123_v11 = vld [vmem:[%s366_s3] sm:$0xff]  ;;  %s218_s6 = sshll.u32 %s314_s2, 4  ;;  %s219_s6 = int_to_ptr.vmem [resolvable:$true] %s218_s6 }
  0x13   :  { %242 = vmatpush3.msra.mxu0 %v39_v2  ;;  %s285_s3 = scalar_lea.vmem %s219_s6, 16  ;;  %s289_s7 = scalar_lea.vmem %s219_s6, 32 }
  0x14   :  { %243 = vmatprep.subr.mxu0 %v312_v0  ;;  %p286_p5 = scmp.ne.s32.totalorder %s219_s6, %s285_s3  ;;  %p290_p6 = scmp.lt.s32.totalorder %s219_s6, %s219_s6 }
  0x15   :  { %244 = vmatpush3.msra.mxu0 %v38_v3  ;;  %p291_p7 = scmp.lt.s32.totalorder %s289_s7, %s285_s3 }
  0x16   :  { %245 = vmatprep.subr.mxu0 %v312_v0 }
  0x17   :  { %246 = vmatpush3.msra.mxu0 %v37_v4  ;;  %p292_p8 = por %p291_p7, %p290_p6 }
  0x18   :  { %248 = vmatmul.mubr.msk.f32.vlgmr.msra.gmra.mxu0 %vm48_vm1, %v36_v5 }
  0x19   :  { %p293_p9 = pnand %p292_p8, %p286_p5 }
  0xd8   :  { %v118_v7 = vpop.f32.mrf.mxu0 }
  0xd9   :  { %v119_v8 = vadd.f32 %v227_v6, %v118_v7 }
  0xda   :  { %v249_v9 = vpop.f32.mrf.mxu0 }
  0xdb   :  { %v122_v10 = vmax.f32 %v119_v8, 0.0 }
  0xdd   :  { %251 = vmatpush3.xpose.msk.msra.mxu1 %vm124_vm2, %v122_v10 }
  0xe0   :  { %253 = vmatmul.mubr.msk.f32.vlgmr.msra.gmra.mxu1 %vm124_vm2, %v123_v11 }
 0x1a0   :  { %v197_v13 = vpop.f32.mrf.mxu1 }
 0x1a1   :  { %v203_v14 = vadd.f32 %v202_v12, %v197_v13 }
 0x1a2   :  { %v254_v15 = vpop.f32.mrf.mxu1 }
 0x1a3   :  { %v231_v16 = vmul.f32 -1.442695, %v203_v14 }
 0x1a5   :  { %261 = vpow2.f32 %v231_v16 }
 0x1b2   :  { %v262_v17 = vpop.eup %261 }
 0x1b3   :  { %v207_v18 = vadd.f32 1.0, %v262_v17 }
 0x1b5   :  { %263 = vrcp.f32 %v207_v18 }
 0x1c2   :  { %v264_v19 = vpop.eup %263 }
 0x1c3   :  { %211 = vst.msk [vmem:[#allocation6] sm:$0x1] %vm210_vm3, %v264_v19 }
 0x1c4   :  { %296 = shalt.err (!%p293_p9)
}
 0x1c5   :  { %221 = dma.vmem_to_hbm [thread:$0]  %s219_s6, 16, %s368_s5, [#allocation5]  }
 0x1c6   :  { %307 = dma.done.wait [#allocation5], 16  }
 0x1c7   :  { %308 = vsyncadd [#allocation5], 4294967280 }
 0x1c8   :  { %225 = vsyncpa [#allocation4], 1 }
 0x1c9   :  { %226 = vsyncpa [#allocation5], 1 }

</bundles_post_ra>
